<compile_context>
chip_gen: v6e
topology: v6e:2x2x1
jax: 0.10.0
libtpu: 0.0.40
codegen_flags: <defaults>
</compile_context>

<pallas_src>
import jax
import jax.numpy as jnp
from jax.experimental import pallas as pl
from jax.experimental.pallas import tpu as pltpu

GAMMA = 0.9                 # unused in forward (kept from the spec)
STATE_DIM = 378
ACTION_DIM = 4
INPUT_SIZE = STATE_DIM + ACTION_DIM   # 382
LAYER1 = 512
LAYER2 = 256
OUTPUT_SIZE = 1
NEG_SLOPE = 0.01            # F.leaky_relu default negative_slope
MAX_TM = 512                # batch-tile rows per grid step (>=256 keeps MXU M-dim busy)


def _leaky_relu(x):
    return jnp.where(x > 0, x, NEG_SLOPE * x)


def dqn_kernel(xs_ref, xa_ref, w1s_ref, w1a_ref, b1_ref,
               w2_ref, b2_ref, w3_ref, b3_ref, o_ref):
    # ---- layer 1: split matmul replaces torch.cat((states, actions), dim=1) ----
    xs = xs_ref[...].astype(jnp.bfloat16)                       # [TM, 378]
    xa = xa_ref[...].astype(jnp.bfloat16)                       # [TM, 4]
    h1 = jnp.dot(xs, w1s_ref[...], preferred_element_type=jnp.float32)
    h1 = h1 + jnp.dot(xa, w1a_ref[...], preferred_element_type=jnp.float32)
    h1 = _leaky_relu(h1 + b1_ref[...])                          # [TM, 512] f32

    # ---- layer 2 ----
    h2 = jnp.dot(h1.astype(jnp.bfloat16), w2_ref[...],
                 preferred_element_type=jnp.float32)
    h2 = _leaky_relu(h2 + b2_ref[...])                          # [TM, 256] f32

    # ---- output layer (N=1): VPU multiply + lane reduction instead of MXU matmul ----
    out = jnp.sum(h2 * w3_ref[...], axis=-1, keepdims=True) + b3_ref[...]
    o_ref[...] = out.astype(o_ref.dtype)                        # [TM, 1]


def dqn_forward(states, actions, params):
    """states: [B, 378] f32, actions: [B, 4] f32 -> Q values [B, 1] f32."""
    w1_s, w1_a, b1, w2, b2, w3_row, b3 = params
    B = states.shape[0]

    tm = B if B <= MAX_TM else MAX_TM
    bp = pl.cdiv(B, tm) * tm
    if bp != B:
        pad = bp - B
        states = jnp.pad(states, ((0, pad), (0, 0)))
        actions = jnp.pad(actions, ((0, pad), (0, 0)))
    nb = bp // tm

    def act_spec(f):       # batch-tiled activations / output
        return pl.BlockSpec((tm, f), lambda i: (i, 0))

    def const_spec(shape):  # weights/biases: same block every step -> stay VMEM-resident
        return pl.BlockSpec(shape, lambda i: (0, 0))

    out = pl.pallas_call(
        dqn_kernel,
        out_shape=jax.ShapeDtypeStruct((bp, OUTPUT_SIZE), jnp.float32),
        grid=(nb,),
        in_specs=[
            act_spec(STATE_DIM),                  # states tile
            act_spec(ACTION_DIM),                 # actions tile
            const_spec((STATE_DIM, LAYER1)),      # w1_s  (bf16)
            const_spec((ACTION_DIM, LAYER1)),     # w1_a  (bf16)
            const_spec((1, LAYER1)),              # b1    (f32)
            const_spec((LAYER1, LAYER2)),         # w2    (bf16)
            const_spec((1, LAYER2)),              # b2    (f32)
            const_spec((1, LAYER2)),              # w3 as a row (f32, used on VPU)
            const_spec((1, OUTPUT_SIZE)),         # b3    (f32)
        ],
        out_specs=act_spec(OUTPUT_SIZE),
        compiler_params=pltpu.CompilerParams(
            dimension_semantics=("parallel",)),   # shard batch tiles across TCs on v7x
    )(states, actions, w1_s, w1_a, b1, w2, b2, w3_row, b3)

    return out[:B] if bp != B else out


def init_params(key):
    """Deterministic init mirroring nn.Linear default (uniform +-1/sqrt(fan_in)).
    Weights are stored as [in, out]; w1 is pre-split into state/action halves;
    matmul weights are stored in bf16, biases and the final row-vector in f32."""
    ks = jax.random.split(key, 6)

    def lin(kw, kb, fan_in, fan_out):
        bound = 1.0 / jnp.sqrt(fan_in)
        w = jax.random.uniform(kw, (fan_in, fan_out), jnp.float32, -bound, bound)
        b = jax.random.uniform(kb, (1, fan_out), jnp.float32, -bound, bound)
        return w, b

    w1, b1 = lin(ks[0], ks[1], INPUT_SIZE, LAYER1)
    w2, b2 = lin(ks[2], ks[3], LAYER1, LAYER2)
    w3, b3 = lin(ks[4], ks[5], LAYER2, OUTPUT_SIZE)

    w1_s = w1[:STATE_DIM, :].astype(jnp.bfloat16)      # [378, 512]
    w1_a = w1[STATE_DIM:, :].astype(jnp.bfloat16)      # [4, 512]
    w2_bf = w2.astype(jnp.bfloat16)                    # [512, 256]
    w3_row = w3.T                                      # [1, 256] f32 (VPU reduce weights)
    return (w1_s, w1_a, b1, w2_bf, b2, w3_row, b3)


def dqn_call(states, actions, params):
    # Mirrors DQN.__call__: (states, actions) -> Q value; concat is fused into the kernel.
    return dqn_forward(states, actions, params)


def dqn_reference(states, actions, params):
    # Pure-JAX reference with the same bf16 operand casts (for tight correctness check).
    w1_s, w1_a, b1, w2, b2, w3_row, b3 = params
    xs = states.astype(jnp.bfloat16)
    xa = actions.astype(jnp.bfloat16)
    h1 = (jnp.dot(xs, w1_s, preferred_element_type=jnp.float32)
          + jnp.dot(xa, w1_a, preferred_element_type=jnp.float32) + b1)
    h1 = _leaky_relu(h1)
    h2 = jnp.dot(h1.astype(jnp.bfloat16), w2, preferred_element_type=jnp.float32) + b2
    h2 = _leaky_relu(h2)
    return jnp.sum(h2 * w3_row, axis=-1, keepdims=True) + b3


# TODO(synk): loss(), save_params/load_params(), copy() are training/IO utilities with no
# forward-kernel equivalent and are intentionally not translated.

if __name__ == "__main__":
    key = jax.random.PRNGKey(0)
    k_param, k_states, k_actions = jax.random.split(key, 3)

    params = init_params(k_param)

    B = 2
    states = jax.random.normal(k_states, (B, STATE_DIM), jnp.float32)
    actions = jax.random.normal(k_actions, (B, ACTION_DIM), jnp.float32)

    out = dqn_call(states, actions, params)
    out = jax.block_until_ready(out)

    ref = dqn_reference(states, actions, params)
    assert out.shape == (B, OUTPUT_SIZE)
    assert jnp.allclose(out, ref, atol=1e-2, rtol=1e-2), (out, ref)

    print("KERNEL_OK")
</pallas_src>

<mosaic_0001>
module attributes {stable_mosaic.version = 11 : i64} {
  func.func @dqn_kernel(%arg0: i32, %arg1: memref<2x378xf32, #tpu.memory_space<vmem>>, %arg2: memref<2x4xf32, #tpu.memory_space<vmem>>, %arg3: memref<378x512xbf16, #tpu.memory_space<vmem>>, %arg4: memref<4x512xbf16, #tpu.memory_space<vmem>>, %arg5: memref<1x512xf32, #tpu.memory_space<vmem>>, %arg6: memref<512x256xbf16, #tpu.memory_space<vmem>>, %arg7: memref<1x256xf32, #tpu.memory_space<vmem>>, %arg8: memref<1x256xf32, #tpu.memory_space<vmem>>, %arg9: memref<1x1xf32, #tpu.memory_space<vmem>>, %arg10: memref<2x1xf32, #tpu.memory_space<vmem>>) attributes {dimension_semantics = [#tpu.dimension_semantics<parallel>], iteration_bounds = array<i64: 1>, scalar_prefetch = 0 : i64, scratch_operands = 0 : i64, tpu.core_type = #tpu.core_type<tc>, window_params = [{transform_indices = @transform_0, window_bounds = array<i64: 2, 378>}, {transform_indices = @transform_1, window_bounds = array<i64: 2, 4>}, {pipeline_mode = #tpu.pipeline_mode<synchronous>, transform_indices = @transform_2, window_bounds = array<i64: 378, 512>}, {pipeline_mode = #tpu.pipeline_mode<synchronous>, transform_indices = @transform_3, window_bounds = array<i64: 4, 512>}, {pipeline_mode = #tpu.pipeline_mode<synchronous>, transform_indices = @transform_4, window_bounds = array<i64: 1, 512>}, {pipeline_mode = #tpu.pipeline_mode<synchronous>, transform_indices = @transform_5, window_bounds = array<i64: 512, 256>}, {pipeline_mode = #tpu.pipeline_mode<synchronous>, transform_indices = @transform_6, window_bounds = array<i64: 1, 256>}, {pipeline_mode = #tpu.pipeline_mode<synchronous>, transform_indices = @transform_7, window_bounds = array<i64: 1, 256>}, {pipeline_mode = #tpu.pipeline_mode<synchronous>, transform_indices = @transform_8, window_bounds = array<i64: 1, 1>}, {transform_indices = @transform_9, window_bounds = array<i64: 2, 1>}]} {
    %c0 = arith.constant 0 : index
    %c0_0 = arith.constant 0 : index
    %0 = vector.load %arg1[%c0, %c0_0] : memref<2x378xf32, #tpu.memory_space<vmem>>, vector<2x378xf32>
    %1 = arith.truncf %0 : vector<2x378xf32> to vector<2x378xbf16>
    %c0_1 = arith.constant 0 : index
    %c0_2 = arith.constant 0 : index
    %2 = vector.load %arg2[%c0_1, %c0_2] : memref<2x4xf32, #tpu.memory_space<vmem>>, vector<2x4xf32>
    %3 = arith.truncf %2 : vector<2x4xf32> to vector<2x4xbf16>
    %c0_3 = arith.constant 0 : index
    %c0_4 = arith.constant 0 : index
    %4 = vector.load %arg3[%c0_3, %c0_4] : memref<378x512xbf16, #tpu.memory_space<vmem>>, vector<378x512xbf16>
    %cst = arith.constant dense<0.000000e+00> : vector<2x512xf32>
    %5 = tpu.matmul %1, %4, %cst {dimension_numbers = #tpu.dot_dimension_numbers<[1], [0], [0], [1], [0, 0, 1, 1], [], []>} : vector<2x378xbf16>, vector<378x512xbf16>, vector<2x512xf32> -> vector<2x512xf32>
    %c0_5 = arith.constant 0 : index
    %c0_6 = arith.constant 0 : index
    %6 = vector.load %arg4[%c0_5, %c0_6] : memref<4x512xbf16, #tpu.memory_space<vmem>>, vector<4x512xbf16>
    %cst_7 = arith.constant dense<0.000000e+00> : vector<2x512xf32>
    %7 = tpu.matmul %3, %6, %cst_7 {dimension_numbers = #tpu.dot_dimension_numbers<[1], [0], [0], [1], [0, 0, 1, 1], [], []>} : vector<2x4xbf16>, vector<4x512xbf16>, vector<2x512xf32> -> vector<2x512xf32>
    %8 = arith.addf %5, %7 : vector<2x512xf32>
    %c0_8 = arith.constant 0 : index
    %c0_9 = arith.constant 0 : index
    %9 = vector.load %arg5[%c0_8, %c0_9] : memref<1x512xf32, #tpu.memory_space<vmem>>, vector<1x512xf32>
    %10 = vector.broadcast %9 : vector<1x512xf32> to vector<2x512xf32>
    %11 = arith.addf %8, %10 : vector<2x512xf32>
    %cst_10 = arith.constant 0.000000e+00 : f32
    %12 = vector.broadcast %cst_10 : f32 to vector<2x512xf32>
    %13 = arith.cmpf ogt, %11, %12 : vector<2x512xf32>
    %cst_11 = arith.constant 0.00999999977 : f32
    %14 = vector.broadcast %cst_11 : f32 to vector<2x512xf32>
    %15 = arith.mulf %14, %11 : vector<2x512xf32>
    %16 = arith.select %13, %11, %15 : vector<2x512xi1>, vector<2x512xf32>
    %17 = arith.truncf %16 : vector<2x512xf32> to vector<2x512xbf16>
    %c0_12 = arith.constant 0 : index
    %c0_13 = arith.constant 0 : index
    %18 = vector.load %arg6[%c0_12, %c0_13] : memref<512x256xbf16, #tpu.memory_space<vmem>>, vector<512x256xbf16>
    %cst_14 = arith.constant dense<0.000000e+00> : vector<2x256xf32>
    %19 = tpu.matmul %17, %18, %cst_14 {dimension_numbers = #tpu.dot_dimension_numbers<[1], [0], [0], [1], [0, 0, 1, 1], [], []>} : vector<2x512xbf16>, vector<512x256xbf16>, vector<2x256xf32> -> vector<2x256xf32>
    %c0_15 = arith.constant 0 : index
    %c0_16 = arith.constant 0 : index
    %20 = vector.load %arg7[%c0_15, %c0_16] : memref<1x256xf32, #tpu.memory_space<vmem>>, vector<1x256xf32>
    %21 = vector.broadcast %20 : vector<1x256xf32> to vector<2x256xf32>
    %22 = arith.addf %19, %21 : vector<2x256xf32>
    %cst_17 = arith.constant 0.000000e+00 : f32
    %23 = vector.broadcast %cst_17 : f32 to vector<2x256xf32>
    %24 = arith.cmpf ogt, %22, %23 : vector<2x256xf32>
    %cst_18 = arith.constant 0.00999999977 : f32
    %25 = vector.broadcast %cst_18 : f32 to vector<2x256xf32>
    %26 = arith.mulf %25, %22 : vector<2x256xf32>
    %27 = arith.select %24, %22, %26 : vector<2x256xi1>, vector<2x256xf32>
    %c0_19 = arith.constant 0 : index
    %c0_20 = arith.constant 0 : index
    %28 = vector.load %arg8[%c0_19, %c0_20] : memref<1x256xf32, #tpu.memory_space<vmem>>, vector<1x256xf32>
    %29 = vector.broadcast %28 : vector<1x256xf32> to vector<2x256xf32>
    %30 = arith.mulf %27, %29 : vector<2x256xf32>
    %cst_21 = arith.constant dense<0.000000e+00> : vector<2xf32>
    %31 = vector.multi_reduction <add>, %30, %cst_21 [1] : vector<2x256xf32> to vector<2xf32>
    %32 = vector.shape_cast %31 : vector<2xf32> to vector<2x1xf32>
    %c0_22 = arith.constant 0 : index
    %c0_23 = arith.constant 0 : index
    %33 = vector.load %arg9[%c0_22, %c0_23] : memref<1x1xf32, #tpu.memory_space<vmem>>, vector<1x1xf32>
    %34 = vector.broadcast %33 : vector<1x1xf32> to vector<2x1xf32>
    %35 = arith.addf %32, %34 : vector<2x1xf32>
    %c0_24 = arith.constant 0 : index
    %c0_25 = arith.constant 0 : index
    %36 = vector.load %arg10[%c0_24, %c0_25] : memref<2x1xf32, #tpu.memory_space<vmem>>, vector<2x1xf32>
    tpu.vector_store %arg10[%c0_24, %c0_25], %35 {strides = array<i32>} : memref<2x1xf32, #tpu.memory_space<vmem>>, vector<2x1xf32>,
    return
  }
  func.func @transform_0(%arg0: i32) -> (i32, i32) {
    %c0_i32 = arith.constant 0 : i32
    %c0_i32_0 = arith.constant 0 : i32
    return %arg0, %c0_i32 : i32, i32
  }
  func.func @transform_1(%arg0: i32) -> (i32, i32) {
    %c0_i32 = arith.constant 0 : i32
    %c0_i32_0 = arith.constant 0 : i32
    return %arg0, %c0_i32 : i32, i32
  }
  func.func @transform_2(%arg0: i32) -> (i32, i32) {
    %c0_i32 = arith.constant 0 : i32
    %c0_i32_0 = arith.constant 0 : i32
    %c0_i32_1 = arith.constant 0 : i32
    return %c0_i32, %c0_i32_0 : i32, i32
  }
  func.func @transform_3(%arg0: i32) -> (i32, i32) {
    %c0_i32 = arith.constant 0 : i32
    %c0_i32_0 = arith.constant 0 : i32
    %c0_i32_1 = arith.constant 0 : i32
    return %c0_i32, %c0_i32_0 : i32, i32
  }
  func.func @transform_4(%arg0: i32) -> (i32, i32) {
    %c0_i32 = arith.constant 0 : i32
    %c0_i32_0 = arith.constant 0 : i32
    %c0_i32_1 = arith.constant 0 : i32
    return %c0_i32, %c0_i32_0 : i32, i32
  }
  func.func @transform_5(%arg0: i32) -> (i32, i32) {
    %c0_i32 = arith.constant 0 : i32
    %c0_i32_0 = arith.constant 0 : i32
    %c0_i32_1 = arith.constant 0 : i32
    return %c0_i32, %c0_i32_0 : i32, i32
  }
  func.func @transform_6(%arg0: i32) -> (i32, i32) {
    %c0_i32 = arith.constant 0 : i32
    %c0_i32_0 = arith.constant 0 : i32
    %c0_i32_1 = arith.constant 0 : i32
    return %c0_i32, %c0_i32_0 : i32, i32
  }
  func.func @transform_7(%arg0: i32) -> (i32, i32) {
    %c0_i32 = arith.constant 0 : i32
    %c0_i32_0 = arith.constant 0 : i32
    %c0_i32_1 = arith.constant 0 : i32
    return %c0_i32, %c0_i32_0 : i32, i32
  }
  func.func @transform_8(%arg0: i32) -> (i32, i32) {
    %c0_i32 = arith.constant 0 : i32
    %c0_i32_0 = arith.constant 0 : i32
    %c0_i32_1 = arith.constant 0 : i32
    return %c0_i32, %c0_i32_0 : i32, i32
  }
  func.func @transform_9(%arg0: i32) -> (i32, i32) {
    %c0_i32 = arith.constant 0 : i32
    %c0_i32_0 = arith.constant 0 : i32
    return %arg0, %c0_i32 : i32, i32
  }
}

</mosaic_0001>

<bundles_post_ra>
// kernel: tpu_custom_call.1
= control target key start
LH: loop header
LB: loop body
LE: loop exit
PB: predicated region body
PF: predicated region fallthrough
CT: control target
= control target key end

     0   :  { %s2195_s0 = inlined_call_operand.hbm [shape: f32[2,378], index: 0, kind: input, shape index: {}]   ;;  %s2196_s1 = inlined_call_operand.vmem [shape: f32[2,4], index: 1, kind: input, shape index: {}]   ;;  %s2197_s2 = inlined_call_operand.hbm [shape: bf16[378,512], index: 2, kind: input, shape index: {}]   ;;  %s2198_s3 = inlined_call_operand.hbm [shape: bf16[4,512], index: 3, kind: input, shape index: {}]   ;;  %s2199_s4 = inlined_call_operand.vmem [shape: f32[1,512], index: 4, kind: input, shape index: {}]   ;;  %s2200_s5 = inlined_call_operand.hbm [shape: bf16[512,256], index: 5, kind: input, shape index: {}]   ;;  %s2201_s6 = inlined_call_operand.vmem [shape: f32[1,256], index: 6, kind: input, shape index: {}]   ;;  %s2202_s7 = inlined_call_operand.vmem [shape: f32[1,256], index: 7, kind: input, shape index: {}]   ;;  %s2203_s8 = inlined_call_operand.<no memory space> [shape: f32[1,1], index: 8, kind: input, shape index: {}]   ;;  %s2204_s9 = inlined_call_operand.vmem [shape: f32[2,1], index: 9, kind: output, shape index: {}]  }
   0x1   :  { %v14_v0 = vstv %s2203_s8 }
   0x2   :  { %15 = vst [vmem:[#allocation2] sm:$0x1] %v14_v0 }
   0x3   :  { %16 = vsyncpa [#allocation4], 0 }
   0x4   :  { %17 = vsyncpa [#allocation6], 0 }
   0x5   :  { %18 = vsyncpa [#allocation9], 0  ;;  %s2052_s11 = smov [#allocation5]  }
   0x6   :  { %s36_s12 = sshll.u32 %s2052_s11, 4  ;;  %s37_s12 = int_to_ptr.vmem [resolvable:$true] %s36_s12 }
   0x7   :  { %s1974_s13 = scalar_lea.vmem %s37_s12, 12288  ;;  %p1979_p1 = scmp.lt.s32.totalorder %s37_s12, %s37_s12 }
   0x8   :  { %p1975_p0 = scmp.ne.s32.totalorder %s37_s12, %s1974_s13  ;;  %p1980_p2 = scmp.lt.s32.totalorder %s1974_s13, %s1974_s13 }
   0xa   :  { %p1981_p3 = por %p1980_p2, %p1979_p1 }
   0xc   :  { %p1982_p4 = pnand %p1981_p3, %p1975_p0 }
   0xe   :  { %1985 = shalt.err (!%p1982_p4)
}
   0xf   :  { %s2053_s14 = smov 256   ;;  %s2054_s15 = smov 16  }
  0x10   :  { %42 = dma.hbm_to_vmem [thread:$0]  %s2197_s2, 12288, %s37_s12, [#allocation6], %s2053_s14, %s2053_s14, %s2054_s15  }
  0x11   :  { %s2055_s8 = smov [#allocation3]   ;;  %s2056_s19 = smov [#allocation7]  }
  0x12   :  { %s25_s18 = sshll.u32 %s2055_s8, 4  ;;  %s49_s20 = sshll.u32 %s2056_s19, 4  ;;  %s26_s18 = int_to_ptr.vmem [resolvable:$true] %s25_s18  ;;  %s50_s20 = int_to_ptr.vmem [resolvable:$true] %s49_s20 }
  0x13   :  { %s1994_s21 = scalar_lea.vmem %s26_s18, 96  ;;  %p1999_p6 = scmp.lt.s32.totalorder %s26_s18, %s26_s18 }
  0x14   :  { %p1995_p5 = scmp.ne.s32.totalorder %s26_s18, %s1994_s21  ;;  %p2000_p7 = scmp.lt.s32.totalorder %s1994_s21, %s1994_s21 }
  0x16   :  { %p2001_p8 = por %p2000_p7, %p1999_p6 }
  0x18   :  { %p2002_p9 = pnand %p2001_p8, %p1995_p5 }
  0x1a   :  { %2005 = shalt.err (!%p2002_p9)
}
  0x1b   :  { %28 = dma.hbm_to_vmem [thread:$0]  %s2195_s0, 96, %s26_s18, [#allocation4]  }
  0x1c   :  { %s2014_s24 = scalar_lea.vmem %s50_s20, 128  ;;  %p2019_p11 = scmp.lt.s32.totalorder %s50_s20, %s50_s20 }
  0x1d   :  { %p2015_p10 = scmp.ne.s32.totalorder %s50_s20, %s2014_s24  ;;  %p2020_p12 = scmp.lt.s32.totalorder %s2014_s24, %s2014_s24 }
  0x1f   :  { %p2021_p13 = por %p2020_p12, %p2019_p11 }
  0x21   :  { %p2022_p0 = pnand %p2021_p13, %p2015_p10 }
  0x23   :  { %2025 = shalt.err (!%p2022_p0)
}
  0x24   :  { %52 = dma.hbm_to_vmem [thread:$0]  %s2198_s3, 128, %s50_s20, [#allocation6]  }
  0x25   :  { %s2057_s26 = smov [#allocation8]  }
  0x26   :  { %s60_s27 = sshll.u32 %s2057_s26, 4  ;;  %s61_s27 = int_to_ptr.vmem [resolvable:$true] %s60_s27 }
  0x27   :  { %s2034_s28 = scalar_lea.vmem %s61_s27, 8192  ;;  %p2039_p2 = scmp.lt.s32.totalorder %s61_s27, %s61_s27 }
  0x28   :  { %p2035_p1 = scmp.ne.s32.totalorder %s61_s27, %s2034_s28  ;;  %p2040_p3 = scmp.lt.s32.totalorder %s2034_s28, %s2034_s28 }
  0x2a   :  { %p2041_p4 = por %p2040_p3, %p2039_p2 }
  0x2c   :  { %p2042_p5 = pnand %p2041_p4, %p2035_p1 }
  0x2e   :  { %2045 = shalt.err (!%p2042_p5)
}
  0x2f   :  { %s2058_s0 = smov 128   ;;  %s2059_s29 = smov 8  }
  0x30   :  { %66 = dma.hbm_to_vmem [thread:$0]  %s2200_s5, 8192, %s61_s27, [#allocation9], %s2058_s0, %s2058_s0, %s2059_s29  }
  0x31   :  { %2046 = dma.done.wait [#allocation4], 96  }
  0x32   :  { %2047 = vsyncadd [#allocation4], 4294967200 }
  0x33   :  { %2048 = dma.done.wait [#allocation6], 12416  }
  0x34   :  { %2049 = vsyncadd [#allocation6], 4294954880 }
  0x35   :  { %2050 = dma.done.wait [#allocation9], 8192  }
  0x36   :  { %2051 = vsyncadd [#allocation9], 4294959104  ;;  %v92_v1 = vlaneseq  ;;  %v2060_v2 = vmov 1983009808   ;;  %v2061_v4 = vmov 0   ;;  %v208_v8 = vld [vmem:[#allocation7] sm:$0xff] }
  0x37   :  { %v90_v3 = vunpack.c.l.s4 %v2060_v2  ;;  %276 = vmatprep.mubr.bf16.mxu0 %v2061_v4  ;;  %317 = vmatprep.mubr.bf16.mxu1 %v2061_v4  ;;  %vm231_vm0 = vcmask 1041408   ;;  %v210_v10 = vcombine.high %v208_v8, %v208_v8  ;;  %v110_v11 = vld [vmem:[%s2196_s1] sm:$0x3]  ;;  %v1727_v15 = vld [vmem:[#allocation5 + $0xe4] ss:$16 sps:$4 sm:$0xff]   ;;  %vm227_vm1 = vcmask 31744  }
  0x38   :  { %v2129_v5 = vshrl.u32 %v92_v1, 7  ;;  %v1728_v16 = vld [vmem:[#allocation5 + $0x2e4] ss:$16 sps:$4 sm:$0x1f]   ;;  %v111_v19 = vpack.c.bf16 %v110_v11, %v110_v11  ;;  %v1725_v21 = vld [vmem:[#allocation5 + $0xe0] ss:$16 sps:$4 sm:$0xff]  }
  0x39   :  { %v91_v6 = vunpack.c.0.s8 %v90_v3  ;;  %v1730_v20 = vld [vmem:[#allocation5 + $0x2e0] ss:$16 sps:$4 sm:$0x1f]   ;;  %vm806_vm2 = vcmask 1044480   ;;  %v1733_v22 = vld [vmem:[#allocation5 + $0xc4] ss:$16 sps:$4 sm:$0xff]  }
  0x3a   :  { %v808_v23 = vsel %vm806_vm2, %v1730_v20, 0  ;;  %v1736_v24 = vld [vmem:[#allocation5 + $0x2c4] ss:$16 sps:$4 sm:$0xff]   ;;  %v1731_v25 = vld [vmem:[#allocation5 + $0xc0] ss:$16 sps:$4 sm:$0xff]   ;;  %vm802_vm3 = vcmask 998400  }
  0x3b   :  { %v2132_v7 = vsub.s32 %v91_v6, %v2129_v5  ;;  %v1739_v26 = vld [vmem:[#allocation5 + $0xa4] ss:$16 sps:$4 sm:$0xff]   ;;  %v1734_v27 = vld [vmem:[#allocation5 + $0x2c0] ss:$16 sps:$4 sm:$0xff]   ;;  %v86_v39 = vld [vmem:[#allocation3] sm:$0x3f] }
  0x3c   :  { %v1742_v28 = vld [vmem:[#allocation5 + $0x2a4] ss:$16 sps:$4 sm:$0xff]   ;;  %v1737_v29 = vld [vmem:[#allocation5 + $0xa0] ss:$16 sps:$4 sm:$0xff]   ;;  %v88_v51 = vcombine.high %v86_v39, %v86_v39  ;;  %v1779_v58 = vld [vmem:[#allocation5 + $0xec] ss:$16 sps:$4 sm:$0xff]  }
  0x3d   :  { %v217_v9 = vrot.slane %v208_v8, %v2132_v7  ;;  %v224_v14 = vrot.slane %v210_v10, %v2132_v7  ;;  %v1745_v30 = vld [vmem:[#allocation5 + $0x84] ss:$16 sps:$4 sm:$0xff]   ;;  %v1740_v31 = vld [vmem:[#allocation5 + $0x2a0] ss:$16 sps:$4 sm:$0xff]   ;;  %v2147_v41 = vrot.slane %v86_v39, %v2132_v7  ;;  %v1777_v62 = vld [vmem:[#allocation5 + $0xe8] ss:$16 sps:$4 sm:$0xff]  }
  0x3e   :  { %v1748_v32 = vld [vmem:[#allocation5 + $0x284] ss:$16 sps:$4 sm:$0xff]   ;;  %v1743_v33 = vld [vmem:[#allocation5 + $0x80] ss:$16 sps:$4 sm:$0xff]   ;;  %v102_v56 = vrot.slane %v88_v51, %v2132_v7  ;;  %v1785_v63 = vld [vmem:[#allocation5 + $0xcc] ss:$16 sps:$4 sm:$0xff]  }
  0x3f   :  { %v225_v12 = vcombine.high %v217_v9, %v217_v9  ;;  %v233_v13 = vsel %vm231_vm0, %v217_v9, 0  ;;  %v226_v17 = vcombine.high %v224_v14, %v224_v14  ;;  %v239_v18 = vsel %vm231_vm0, %v224_v14, 0  ;;  %v1751_v34 = vld [vmem:[#allocation5 + $0x64] ss:$16 sps:$4 sm:$0xff]   ;;  %v1746_v35 = vld [vmem:[#allocation5 + $0x280] ss:$16 sps:$4 sm:$0xff]  }
  0x40   :  { %v1754_v36 = vld [vmem:[#allocation5 + $0x264] ss:$16 sps:$4 sm:$0xff]   ;;  %v1749_v37 = vld [vmem:[#allocation5 + $0x60] ss:$16 sps:$4 sm:$0xff]   ;;  %v103_v44 = vcombine.high %v2147_v41, %v2147_v41  ;;  %v2152_v60 = vpack.c.bf16 %v102_v56, %v102_v56  ;;  %v1783_v2 = vld [vmem:[#allocation5 + $0xc8] ss:$16 sps:$4 sm:$0xff]  }
  0x41   :  { %1545 = vmatprep.subr.msk.bf16.mxu0 %vm231_vm0, %v225_v12  ;;  %1547 = vmatprep.subr.msk.bf16.mxu1 %vm231_vm0, %v226_v17  ;;  %v1757_v38 = vld [vmem:[#allocation5 + $0x44] ss:$16 sps:$4 sm:$0xff]   ;;  %v1752_v40 = vld [vmem:[#allocation5 + $0x260] ss:$16 sps:$4 sm:$0xff]   ;;  %v1791_v3 = vld [vmem:[#allocation5 + $0xac] ss:$16 sps:$4 sm:$0xff]  }
  0x42   :  { %259 = vmatpush1.bf16.msra.mxu0 %v233_v13  ;;  %300 = vmatpush1.bf16.msra.mxu1 %v239_v18  ;;  %v1760_v42 = vld [vmem:[#allocation5 + $0x244] ss:$16 sps:$4 sm:$0xff]   ;;  %v1755_v43 = vld [vmem:[#allocation5 + $0x40] ss:$16 sps:$4 sm:$0xff]   ;;  %v108_v47 = vpack.c.bf16 %v103_v44, %v103_v44  ;;  %v1789_v8 = vld [vmem:[#allocation5 + $0xa8] ss:$16 sps:$4 sm:$0xff]  }
  0x43   :  { %819 = vmatprep.subr.bf16.mxu0 %v1727_v15  ;;  %1645 = vmatprep.subr.msk.bf16.mxu1 %vm806_vm2, %v1728_v16  ;;  %v1763_v45 = vld [vmem:[#allocation5 + $0x24] ss:$16 sps:$4 sm:$0xff]   ;;  %v1758_v46 = vld [vmem:[#allocation5 + $0x240] ss:$16 sps:$4 sm:$0xff]   ;;  %v1797_v9 = vld [vmem:[#allocation5 + $0x8c] ss:$16 sps:$4 sm:$0xff]  }
  0x44   :  { %v1766_v48 = vld [vmem:[#allocation5 + $0x224] ss:$16 sps:$4 sm:$0xff]   ;;  %v1761_v49 = vld [vmem:[#allocation5 + $0x20] ss:$16 sps:$4 sm:$0xff]   ;;  %v1795_v12 = vld [vmem:[#allocation5 + $0x88] ss:$16 sps:$4 sm:$0xff]  }
  0x45   :  { %1546 = vmatmul.mubr.msk.bf16.vlgmr.msra.gmra.mxu0 %vm227_vm1, %v111_v19  ;;  %1548 = vmatmul.mubr.msk.bf16.vlgmr.msra.gmra.mxu1 %vm227_vm1, %v111_v19  ;;  %v1769_v50 = vld [vmem:[#allocation5 + $0x4] ss:$16 sps:$4 sm:$0xff]   ;;  %v1764_v52 = vld [vmem:[#allocation5 + $0x220] ss:$16 sps:$4 sm:$0xff]   ;;  %v1803_v13 = vld [vmem:[#allocation5 + $0x6c] ss:$16 sps:$4 sm:$0xff]  }
  0x46   :  { %820 = vmatpush1.bf16.msra.mxu0 %v1725_v21  ;;  %861 = vmatpush1.bf16.msra.mxu1 %v808_v23  ;;  %v1772_v53 = vld [vmem:[#allocation5 + $0x204] ss:$16 sps:$4 sm:$0xff]   ;;  %v1767_v54 = vld [vmem:[#allocation5] ss:$16 sps:$4 sm:$0xff]   ;;  %v1801_v16 = vld [vmem:[#allocation5 + $0x68] ss:$16 sps:$4 sm:$0xff]  }
  0x47   :  { %821 = vmatprep.subr.bf16.mxu0 %v1733_v22  ;;  %892 = vmatprep.mubr.bf16.mxu1 %v2061_v4  ;;  %v1775_v55 = vld [vmem:[#allocation5 + $0x1e4] ss:$16 sps:$4 sm:$0xff]   ;;  %v1770_v57 = vld [vmem:[#allocation5 + $0x200] ss:$16 sps:$4 sm:$0xff]   ;;  %v1809_v17 = vld [vmem:[#allocation5 + $0x4c] ss:$16 sps:$4 sm:$0xff]  }
  0x48   :  { %862 = vmatprep.subr.bf16.mxu1 %v1736_v24  ;;  %851 = vmatprep.mubr.bf16.mxu0 %v108_v47  ;;  %v1773_v59 = vld [vmem:[#allocation5 + $0x1e0] ss:$16 sps:$4 sm:$0xff]   ;;  %v1782_v61 = vld [vmem:[#allocation5 + $0x1c4] ss:$16 sps:$4 sm:$0xff]   ;;  %v1807_v20 = vld [vmem:[#allocation5 + $0x48] ss:$16 sps:$4 sm:$0xff]  }
  0x49   :  { %v1780_v0 = vld [vmem:[#allocation5 + $0x1c0] ss:$16 sps:$4 sm:$0xff]   ;;  %v1788_v1 = vld [vmem:[#allocation5 + $0x1a4] ss:$16 sps:$4 sm:$0xff]   ;;  %v1815_v21 = vld [vmem:[#allocation5 + $0x2c] ss:$16 sps:$4 sm:$0xff]  }
  0x4a   :  { %822 = vmatpush1.bf16.msra.mxu0 %v1731_v25  ;;  %863 = vmatpush1.bf16.msra.mxu1 %v1734_v27  ;;  %v1786_v6 = vld [vmem:[#allocation5 + $0x1a0] ss:$16 sps:$4 sm:$0xff]   ;;  %v1794_v7 = vld [vmem:[#allocation5 + $0x184] ss:$16 sps:$4 sm:$0xff]   ;;  %v1813_v23 = vld [vmem:[#allocation5 + $0x28] ss:$16 sps:$4 sm:$0xff]  }
  0x4b   :  { %823 = vmatprep.subr.bf16.mxu0 %v1739_v26  ;;  %864 = vmatprep.subr.bf16.mxu1 %v1742_v28  ;;  %v1792_v10 = vld [vmem:[#allocation5 + $0x180] ss:$16 sps:$4 sm:$0xff]   ;;  %v1800_v11 = vld [vmem:[#allocation5 + $0x164] ss:$16 sps:$4 sm:$0xff]   ;;  %v1821_v26 = vld [vmem:[#allocation5 + $0xc] ss:$16 sps:$4 sm:$0xff]  }
  0x4c   :  { %v1798_v14 = vld [vmem:[#allocation5 + $0x160] ss:$16 sps:$4 sm:$0xff]   ;;  %v1806_v15 = vld [vmem:[#allocation5 + $0x144] ss:$16 sps:$4 sm:$0xff]   ;;  %v1839_v39 = vld [vmem:[#allocation5 + $0x1ac] ss:$16 sps:$4 sm:$0xff]  }
  0x4d   :  { %v1804_v18 = vld [vmem:[#allocation5 + $0x140] ss:$16 sps:$4 sm:$0xff]   ;;  %v1812_v19 = vld [vmem:[#allocation5 + $0x124] ss:$16 sps:$4 sm:$0xff]   ;;  %v1840_v44 = vld [vmem:[#allocation5 + $0x288] ss:$16 sps:$4 sm:$0xff]  }
  0x4e   :  { %824 = vmatpush1.bf16.msra.mxu0 %v1737_v29  ;;  %865 = vmatpush1.bf16.msra.mxu1 %v1740_v31  ;;  %v1810_v22 = vld [vmem:[#allocation5 + $0x120] ss:$16 sps:$4 sm:$0xff]   ;;  %v1818_v24 = vld [vmem:[#allocation5 + $0x104] ss:$16 sps:$4 sm:$0xff]   ;;  %v1819_v29 = vld [vmem:[#allocation5 + $0x8] ss:$16 sps:$4 sm:$0xff]   ;;  %v2158_v31 = vpack.c.bf16 %v2147_v41, %v2147_v41 }
  0x4f   :  { %825 = vmatprep.subr.bf16.mxu0 %v1745_v30  ;;  %866 = vmatprep.subr.bf16.mxu1 %v1748_v32  ;;  %v1816_v25 = vld [vmem:[#allocation5 + $0x100] ss:$16 sps:$4 sm:$0xff]   ;;  %v1822_v27 = vld [vmem:[#allocation5 + $0x2ec] ss:$16 sps:$4 sm:$0x1f]   ;;  %vm1536_vm10 = vcmask 1024  }
  0x50   :  { %v1824_v28 = vld [vmem:[#allocation5 + $0x2e8] ss:$16 sps:$4 sm:$0x1f]   ;;  %v1827_v30 = vld [vmem:[#allocation5 + $0x1ec] ss:$16 sps:$4 sm:$0xff]  }
  0x51   :  { %v1830_v32 = vld [vmem:[#allocation5 + $0x2cc] ss:$16 sps:$4 sm:$0xff]   ;;  %v1852_v51 = vld [vmem:[#allocation5 + $0x248] ss:$16 sps:$4 sm:$0xff]  }
  0x52   :  { %826 = vmatpush1.bf16.msra.mxu0 %v1743_v33  ;;  %867 = vmatpush1.bf16.msra.mxu1 %v1746_v35  ;;  %v1825_v33 = vld [vmem:[#allocation5 + $0x1e8] ss:$16 sps:$4 sm:$0xff]   ;;  %v1833_v35 = vld [vmem:[#allocation5 + $0x1cc] ss:$16 sps:$4 sm:$0xff]  }
  0x53   :  { %827 = vmatprep.subr.bf16.mxu0 %v1751_v34  ;;  %868 = vmatprep.subr.bf16.mxu1 %v1754_v36  ;;  %v814_v34 = vsel %vm806_vm2, %v1824_v28, 0  ;;  %v1828_v36 = vld [vmem:[#allocation5 + $0x2c8] ss:$16 sps:$4 sm:$0xff]   ;;  %v1842_v41 = vld [vmem:[#allocation5 + $0x28c] ss:$16 sps:$4 sm:$0xff]  }
  0x54   :  { %v1866_v56 = vld [vmem:[#allocation5 + $0x20c] ss:$16 sps:$4 sm:$0xff]   ;;  %v1900_v28 = vld [vmem:[#allocation8 + $0xe0] ss:$8 sps:$4 sm:$0xff]  }
  0x56   :  { %828 = vmatpush1.bf16.msra.mxu0 %v1749_v37  ;;  %869 = vmatpush1.bf16.msra.mxu1 %v1752_v40  ;;  %v1836_v37 = vld [vmem:[#allocation5 + $0x2ac] ss:$16 sps:$4 sm:$0xff]   ;;  %v1834_v40 = vld [vmem:[#allocation5 + $0x2a8] ss:$16 sps:$4 sm:$0xff]  }
  0x57   :  { %829 = vmatprep.subr.bf16.mxu0 %v1757_v38  ;;  %870 = vmatprep.subr.bf16.mxu1 %v1760_v42  ;;  %v1831_v38 = vld [vmem:[#allocation5 + $0x1c8] ss:$16 sps:$4 sm:$0xff]  }
  0x58   :  { %v1837_v42 = vld [vmem:[#allocation5 + $0x1a8] ss:$16 sps:$4 sm:$0xff]  }
  0x5a   :  { %830 = vmatpush1.bf16.msra.mxu0 %v1755_v43  ;;  %871 = vmatpush1.bf16.msra.mxu1 %v1758_v46  ;;  %v1845_v43 = vld [vmem:[#allocation5 + $0x18c] ss:$16 sps:$4 sm:$0xff]  }
  0x5b   :  { %831 = vmatprep.subr.bf16.mxu0 %v1763_v45  ;;  %872 = vmatprep.subr.bf16.mxu1 %v1766_v48  ;;  %v1843_v45 = vld [vmem:[#allocation5 + $0x188] ss:$16 sps:$4 sm:$0xff]   ;;  %v1848_v46 = vld [vmem:[#allocation5 + $0x26c] ss:$16 sps:$4 sm:$0xff]  }
  0x5c   :  { %v1854_v48 = vld [vmem:[#allocation5 + $0x24c] ss:$16 sps:$4 sm:$0xff]  }
  0x5e   :  { %832 = vmatpush1.bf16.msra.mxu0 %v1761_v49  ;;  %873 = vmatpush1.bf16.msra.mxu1 %v1764_v52  ;;  %v1849_v49 = vld [vmem:[#allocation5 + $0x168] ss:$16 sps:$4 sm:$0xff]   ;;  %v1860_v52 = vld [vmem:[#allocation5 + $0x22c] ss:$16 sps:$4 sm:$0xff]  }
  0x5f   :  { %833 = vmatprep.subr.bf16.mxu0 %v1769_v50  ;;  %874 = vmatprep.subr.bf16.mxu1 %v1772_v53  ;;  %v1857_v50 = vld [vmem:[#allocation5 + $0x14c] ss:$16 sps:$4 sm:$0xff]   ;;  %v1855_v53 = vld [vmem:[#allocation5 + $0x148] ss:$16 sps:$4 sm:$0xff]  }
  0x62   :  { %834 = vmatpush1.bf16.msra.mxu0 %v1767_v54  ;;  %875 = vmatpush1.bf16.msra.mxu1 %v1770_v57  ;;  %v1863_v54 = vld [vmem:[#allocation5 + $0x12c] ss:$16 sps:$4 sm:$0xff]   ;;  %v1861_v57 = vld [vmem:[#allocation5 + $0x128] ss:$16 sps:$4 sm:$0xff]  }
  0x63   :  { %835 = vmatprep.subr.bf16.mxu0 %v1775_v55  ;;  %901 = vmatprep.subr.bf16.mxu1 %v1779_v58  ;;  %v1858_v55 = vld [vmem:[#allocation5 + $0x228] ss:$16 sps:$4 sm:$0xff]   ;;  %v1869_v58 = vld [vmem:[#allocation5 + $0x10c] ss:$16 sps:$4 sm:$0xff]  }
  0x65   :  { %1646 = vmatmul.mubr.msk.bf16.vlgmr.msra.gmra.mxu1 %vm802_vm3, %v2152_v60 }
  0x66   :  { %836 = vmatpush2.bf16.msra.mxu0 %v1773_v59  ;;  %902 = vmatpush1.bf16.msra.mxu1 %v1777_v62  ;;  %v1864_v59 = vld [vmem:[#allocation5 + $0x208] ss:$16 sps:$4 sm:$0xff]  }
  0x67   :  { %837 = vmatprep.subr.bf16.mxu0 %v1782_v61  ;;  %933 = vmatprep.mubr.bf16.mxu1 %v108_v47  ;;  %v1846_v47 = vld [vmem:[#allocation5 + $0x268] ss:$16 sps:$4 sm:$0xff]   ;;  %v1872_v61 = vld [vmem:[#allocation8 + $0x74] ss:$8 sps:$4 sm:$0xff]  }
  0x68   :  { %903 = vmatprep.subr.bf16.mxu1 %v1785_v63  ;;  %v1867_v62 = vld [vmem:[#allocation5 + $0x108] ss:$16 sps:$4 sm:$0xff]  }
  0x69   :  { %v1870_v63 = vld [vmem:[#allocation8 + $0x70] ss:$8 sps:$4 sm:$0xff]  }
  0x6a   :  { %838 = vmatpush2.bf16.msra.mxu0 %v1780_v0  ;;  %904 = vmatpush1.bf16.msra.mxu1 %v1783_v2  ;;  %v1875_v0 = vld [vmem:[#allocation8 + $0x64] ss:$8 sps:$4 sm:$0xff]   ;;  %v1878_v2 = vld [vmem:[#allocation8 + $0x54] ss:$8 sps:$4 sm:$0xff]  }
  0x6b   :  { %839 = vmatprep.subr.bf16.mxu0 %v1788_v1  ;;  %905 = vmatprep.subr.bf16.mxu1 %v1791_v3  ;;  %v1873_v1 = vld [vmem:[#allocation8 + $0x60] ss:$8 sps:$4 sm:$0xff]   ;;  %v1876_v3 = vld [vmem:[#allocation8 + $0x50] ss:$8 sps:$4 sm:$0xff]  }
  0x6e   :  { %840 = vmatpush2.bf16.msra.mxu0 %v1786_v6  ;;  %906 = vmatpush1.bf16.msra.mxu1 %v1789_v8  ;;  %v1881_v6 = vld [vmem:[#allocation8 + $0x44] ss:$8 sps:$4 sm:$0xff]   ;;  %v1897_v8 = vld [vmem:[#allocation8 + $0x170] ss:$8 sps:$4 sm:$0xff]  }
  0x6f   :  { %841 = vmatprep.subr.bf16.mxu0 %v1794_v7  ;;  %907 = vmatprep.subr.bf16.mxu1 %v1797_v9  ;;  %v1879_v7 = vld [vmem:[#allocation8 + $0x40] ss:$8 sps:$4 sm:$0xff]   ;;  %v1899_v9 = vld [vmem:[#allocation8 + $0x174] ss:$8 sps:$4 sm:$0xff]  }
  0x72   :  { %842 = vmatpush2.bf16.msra.mxu0 %v1792_v10  ;;  %908 = vmatpush1.bf16.msra.mxu1 %v1795_v12  ;;  %v1884_v10 = vld [vmem:[#allocation8 + $0x34] ss:$8 sps:$4 sm:$0xff]   ;;  %v1882_v12 = vld [vmem:[#allocation8 + $0x30] ss:$8 sps:$4 sm:$0xff]  }
  0x73   :  { %843 = vmatprep.subr.bf16.mxu0 %v1800_v11  ;;  %909 = vmatprep.subr.bf16.mxu1 %v1803_v13  ;;  %v1905_v11 = vld [vmem:[#allocation8 + $0x164] ss:$8 sps:$4 sm:$0xff]   ;;  %v1911_v13 = vld [vmem:[#allocation8 + $0x154] ss:$8 sps:$4 sm:$0xff]  }
  0x76   :  { %844 = vmatpush2.bf16.msra.mxu0 %v1798_v14  ;;  %910 = vmatpush1.bf16.msra.mxu1 %v1801_v16  ;;  %v1887_v14 = vld [vmem:[#allocation8 + $0x24] ss:$8 sps:$4 sm:$0xff]   ;;  %v1885_v16 = vld [vmem:[#allocation8 + $0x20] ss:$8 sps:$4 sm:$0xff]  }
  0x77   :  { %845 = vmatprep.subr.bf16.mxu0 %v1806_v15  ;;  %911 = vmatprep.subr.bf16.mxu1 %v1809_v17  ;;  %v1909_v15 = vld [vmem:[#allocation8 + $0x150] ss:$8 sps:$4 sm:$0xff]   ;;  %v1917_v17 = vld [vmem:[#allocation8 + $0x144] ss:$8 sps:$4 sm:$0xff]  }
  0x7a   :  { %846 = vmatpush2.bf16.msra.mxu0 %v1804_v18  ;;  %912 = vmatpush1.bf16.msra.mxu1 %v1807_v20  ;;  %v1890_v18 = vld [vmem:[#allocation8 + $0x14] ss:$8 sps:$4 sm:$0xff]   ;;  %v1888_v20 = vld [vmem:[#allocation8 + $0x10] ss:$8 sps:$4 sm:$0xff]  }
  0x7b   :  { %847 = vmatprep.subr.bf16.mxu0 %v1812_v19  ;;  %913 = vmatprep.subr.bf16.mxu1 %v1815_v21  ;;  %v1915_v19 = vld [vmem:[#allocation8 + $0x140] ss:$8 sps:$4 sm:$0xff]   ;;  %v1893_v21 = vld [vmem:[#allocation8 + $0x4] ss:$8 sps:$4 sm:$0xff]  }
  0x7e   :  { %848 = vmatpush2.bf16.msra.mxu0 %v1810_v22  ;;  %914 = vmatpush1.bf16.msra.mxu1 %v1813_v23  ;;  %v1891_v22 = vld [vmem:[#allocation8] ss:$8 sps:$4 sm:$0xff]   ;;  %v1896_v23 = vld [vmem:[#allocation8 + $0xf4] ss:$8 sps:$4 sm:$0xff]  }
  0x7f   :  { %849 = vmatprep.subr.bf16.mxu0 %v1818_v24  ;;  %915 = vmatprep.subr.bf16.mxu1 %v1821_v26  ;;  %v1894_v24 = vld [vmem:[#allocation8 + $0xf0] ss:$8 sps:$4 sm:$0xff]   ;;  %v1923_v26 = vld [vmem:[#allocation8 + $0x134] ss:$8 sps:$4 sm:$0xff]  }
  0x82   :  { %850 = vmatpush2.bf16.msra.mxu0 %v1816_v25  ;;  %916 = vmatpush1.bf16.msra.mxu1 %v1819_v29  ;;  %v1902_v25 = vld [vmem:[#allocation8 + $0xe4] ss:$8 sps:$4 sm:$0xff]   ;;  %v1908_v29 = vld [vmem:[#allocation8 + $0xd4] ss:$8 sps:$4 sm:$0xff]  }
  0x83   :  { %1647 = vmatprep.subr.msk.bf16.mxu0 %vm806_vm2, %v1822_v27  ;;  %917 = vmatprep.subr.bf16.mxu1 %v1827_v30  ;;  %v1921_v27 = vld [vmem:[#allocation8 + $0x130] ss:$8 sps:$4 sm:$0xff]   ;;  %v1929_v30 = vld [vmem:[#allocation8 + $0x124] ss:$8 sps:$4 sm:$0xff]  }
  0x85   :  { %852 = vmatmul.mubr.bf16.vlgmr.msra.gmra.mxu0 %v2158_v31 }
  0x86   :  { %943 = vmatpush1.bf16.msra.mxu0 %v814_v34  ;;  %974 = vmatprep.mubr.bf16.mxu0 %v2061_v4  ;;  %v1851_v4 = vld [vmem:[#allocation5 + $0x16c] ss:$16 sps:$4 sm:$0xff]   ;;  %v1933_v34 = vld [vmem:[#allocation8 + $0x110] ss:$8 sps:$4 sm:$0xff]  }
  0x87   :  { %944 = vmatprep.subr.bf16.mxu0 %v1830_v32  ;;  %918 = vmatpush2.bf16.msra.mxu1 %v1825_v33  ;;  %v1906_v32 = vld [vmem:[#allocation8 + $0xd0] ss:$8 sps:$4 sm:$0xff]   ;;  %v1914_v33 = vld [vmem:[#allocation8 + $0xc4] ss:$8 sps:$4 sm:$0xff]  }
  0x88   :  { %919 = vmatprep.subr.bf16.mxu1 %v1833_v35  ;;  %v1935_v35 = vld [vmem:[#allocation8 + $0x114] ss:$8 sps:$4 sm:$0xff]  }
  0x8a   :  { %945 = vmatpush1.bf16.msra.mxu0 %v1828_v36  ;;  %v1941_v36 = vld [vmem:[#allocation8 + $0x104] ss:$8 sps:$4 sm:$0xff]  }
  0x8b   :  { %946 = vmatprep.subr.bf16.mxu0 %v1836_v37  ;;  %920 = vmatpush2.bf16.msra.mxu1 %v1831_v38  ;;  %v1912_v37 = vld [vmem:[#allocation8 + $0xc0] ss:$8 sps:$4 sm:$0xff]   ;;  %v1920_v38 = vld [vmem:[#allocation8 + $0xb4] ss:$8 sps:$4 sm:$0xff]  }
  0x8c   :  { %921 = vmatprep.subr.bf16.mxu1 %v1839_v39  ;;  %v1939_v39 = vld [vmem:[#allocation8 + $0x100] ss:$8 sps:$4 sm:$0xff]  }
  0x8e   :  { %947 = vmatpush1.bf16.msra.mxu0 %v1834_v40  ;;  %v1918_v40 = vld [vmem:[#allocation8 + $0xb0] ss:$8 sps:$4 sm:$0xff]  }
  0x8f   :  { %948 = vmatprep.subr.bf16.mxu0 %v1842_v41  ;;  %922 = vmatpush2.bf16.msra.mxu1 %v1837_v42  ;;  %v1926_v41 = vld [vmem:[#allocation8 + $0xa4] ss:$8 sps:$4 sm:$0xff]   ;;  %v1942_v42 = vld [vmem:[#allocation8 + $0x1f0] ss:$8 sps:$4 sm:$0xff]  }
  0x90   :  { %923 = vmatprep.subr.bf16.mxu1 %v1845_v43  ;;  %v1944_v43 = vld [vmem:[#allocation8 + $0x1f4] ss:$8 sps:$4 sm:$0xff]  }
  0x92   :  { %949 = vmatpush1.bf16.msra.mxu0 %v1840_v44  ;;  %v1947_v44 = vld [vmem:[#allocation8 + $0x1e4] ss:$8 sps:$4 sm:$0xff]  }
  0x93   :  { %950 = vmatprep.subr.bf16.mxu0 %v1848_v46  ;;  %924 = vmatpush2.bf16.msra.mxu1 %v1843_v45  ;;  %v1924_v45 = vld [vmem:[#allocation8 + $0xa0] ss:$8 sps:$4 sm:$0xff]   ;;  %v1932_v46 = vld [vmem:[#allocation8 + $0x94] ss:$8 sps:$4 sm:$0xff]  }
  0x94   :  { %925 = vmatprep.subr.bf16.mxu1 %v1851_v4  ;;  %v1950_v4 = vld [vmem:[#allocation8 + $0x1d4] ss:$8 sps:$4 sm:$0xff]  }
  0x96   :  { %951 = vmatpush1.bf16.msra.mxu0 %v1846_v47  ;;  %v1945_v47 = vld [vmem:[#allocation8 + $0x1e0] ss:$8 sps:$4 sm:$0xff]  }
  0x97   :  { %952 = vmatprep.subr.bf16.mxu0 %v1854_v48  ;;  %926 = vmatpush2.bf16.msra.mxu1 %v1849_v49  ;;  %v1930_v48 = vld [vmem:[#allocation8 + $0x90] ss:$8 sps:$4 sm:$0xff]   ;;  %v1938_v49 = vld [vmem:[#allocation8 + $0x84] ss:$8 sps:$4 sm:$0xff]  }
  0x98   :  { %927 = vmatprep.subr.bf16.mxu1 %v1857_v50  ;;  %v1948_v50 = vld [vmem:[#allocation8 + $0x1d0] ss:$8 sps:$4 sm:$0xff]  }
  0x9a   :  { %953 = vmatpush1.bf16.msra.mxu0 %v1852_v51  ;;  %v1953_v51 = vld [vmem:[#allocation8 + $0x1c4] ss:$8 sps:$4 sm:$0xff]  }
  0x9b   :  { %954 = vmatprep.subr.bf16.mxu0 %v1860_v52  ;;  %928 = vmatpush2.bf16.msra.mxu1 %v1855_v53  ;;  %v1936_v52 = vld [vmem:[#allocation8 + $0x80] ss:$8 sps:$4 sm:$0xff]  }
  0x9c   :  { %929 = vmatprep.subr.bf16.mxu1 %v1863_v54  ;;  %v1951_v53 = vld [vmem:[#allocation8 + $0x1c0] ss:$8 sps:$4 sm:$0xff]   ;;  %v1956_v54 = vld [vmem:[#allocation8 + $0x1b4] ss:$8 sps:$4 sm:$0xff]  }
  0x9e   :  { %955 = vmatpush1.bf16.msra.mxu0 %v1858_v55  ;;  %v1954_v55 = vld [vmem:[#allocation8 + $0x1b0] ss:$8 sps:$4 sm:$0xff]  }
  0x9f   :  { %956 = vmatprep.subr.bf16.mxu0 %v1866_v56  ;;  %930 = vmatpush2.bf16.msra.mxu1 %v1861_v57  ;;  %v1959_v56 = vld [vmem:[#allocation8 + $0x1a4] ss:$8 sps:$4 sm:$0xff]   ;;  %v1957_v57 = vld [vmem:[#allocation8 + $0x1a0] ss:$8 sps:$4 sm:$0xff]  }
  0xa0   :  { %931 = vmatprep.subr.bf16.mxu1 %v1869_v58  ;;  %v1962_v58 = vld [vmem:[#allocation8 + $0x194] ss:$8 sps:$4 sm:$0xff]  }
  0xa2   :  { %957 = vmatpush1.bf16.msra.mxu0 %v1864_v59  ;;  %v1960_v59 = vld [vmem:[#allocation8 + $0x190] ss:$8 sps:$4 sm:$0xff]  }
  0xa3   :  { %1421 = vmatprep.subr.bf16.mxu0 %v1872_v61  ;;  %932 = vmatpush2.bf16.msra.mxu1 %v1867_v62  ;;  %v1965_v61 = vld [vmem:[#allocation8 + $0x184] ss:$8 sps:$4 sm:$0xff]   ;;  %v1963_v62 = vld [vmem:[#allocation8 + $0x180] ss:$8 sps:$4 sm:$0xff]  }
  0xa4   :  { %1462 = vmatprep.subr.bf16.mxu1 %v1899_v9 }
  0xa5   :  { %1648 = vmatmul.mubr.msk.bf16.vlgmr.msra.gmra.mxu0 %vm802_vm3, %v2152_v60  ;;  %v1903_v60 = vld [vmem:[#allocation8 + $0x160] ss:$8 sps:$4 sm:$0xff]  }
  0xa6   :  { %1422 = vmatpush1.bf16.msra.mxu0 %v1870_v63  ;;  %934 = vmatmul.mubr.bf16.vlgmr.msra.gmra.mxu1 %v2158_v31  ;;  %v1927_v31 = vld [vmem:[#allocation8 + $0x120] ss:$8 sps:$4 sm:$0xff]  }
  0xa7   :  { %1423 = vmatprep.subr.bf16.mxu0 %v1875_v0  ;;  %1463 = vmatpush1.bf16.msra.mxu1 %v1897_v8 }
  0xa8   :  { %1464 = vmatprep.subr.bf16.mxu1 %v1905_v11 }
  0xaa   :  { %1424 = vmatpush1.bf16.msra.mxu0 %v1873_v1 }
  0xab   :  { %1425 = vmatprep.subr.bf16.mxu0 %v1878_v2  ;;  %1465 = vmatpush1.bf16.msra.mxu1 %v1903_v60 }
  0xac   :  { %1466 = vmatprep.subr.bf16.mxu1 %v1911_v13  ;;  %v983_v13 = vld [vmem:[%s2199_s4] sm:$0xf] }
  0xae   :  { %1426 = vmatpush1.bf16.msra.mxu0 %v1876_v3 }
  0xaf   :  { %1427 = vmatprep.subr.bf16.mxu0 %v1881_v6  ;;  %1467 = vmatpush1.bf16.msra.mxu1 %v1909_v15 }
  0xb0   :  { %1468 = vmatprep.subr.bf16.mxu1 %v1917_v17 }
  0xb2   :  { %1428 = vmatpush1.bf16.msra.mxu0 %v1879_v7 }
  0xb3   :  { %1429 = vmatprep.subr.bf16.mxu0 %v1884_v10  ;;  %1469 = vmatpush1.bf16.msra.mxu1 %v1915_v19 }
  0xb4   :  { %1470 = vmatprep.subr.bf16.mxu1 %v1923_v26 }
  0xb6   :  { %1430 = vmatpush1.bf16.msra.mxu0 %v1882_v12  ;;  %v2168_v12 = vsub.s32 0, %v2129_v5 }
  0xb7   :  { %1431 = vmatprep.subr.bf16.mxu0 %v1887_v14  ;;  %1471 = vmatpush1.bf16.msra.mxu1 %v1921_v27  ;;  %v2174_v14 = vsub.s32 1, %v2129_v5 }
  0xb8   :  { %1472 = vmatprep.subr.bf16.mxu1 %v1929_v30  ;;  %v988_v17 = vrot.slane %v983_v13, %v2168_v12 }
  0xba   :  { %1432 = vmatpush1.bf16.msra.mxu0 %v1885_v16 }
  0xbb   :  { %1433 = vmatprep.subr.bf16.mxu0 %v1890_v18  ;;  %1473 = vmatpush1.bf16.msra.mxu1 %v1927_v31 }
  0xbc   :  { %1474 = vmatprep.subr.bf16.mxu1 %v1935_v35  ;;  %v999_v35 = vsub.s32 3, %v2129_v5 }
  0xbe   :  { %1434 = vmatpush1.bf16.msra.mxu0 %v1888_v20 }
  0xbf   :  { %1435 = vmatprep.subr.bf16.mxu0 %v1893_v21  ;;  %1475 = vmatpush1.bf16.msra.mxu1 %v1933_v34  ;;  %v992_v21 = vrot.slane %v983_v13, %v2174_v14 }
  0xc0   :  { %1476 = vmatprep.subr.bf16.mxu1 %v1941_v36 }
  0xc2   :  { %1436 = vmatpush1.bf16.msra.mxu0 %v1891_v22 }
  0xc3   :  { %1437 = vmatprep.subr.bf16.mxu0 %v1896_v23  ;;  %1477 = vmatpush1.bf16.msra.mxu1 %v1939_v39 }
  0xc4   :  { %1478 = vmatprep.subr.bf16.mxu1 %v1944_v43 }
  0xc6   :  { %1438 = vmatpush2.bf16.msra.mxu0 %v1894_v24 }
  0xc7   :  { %1439 = vmatprep.subr.bf16.mxu0 %v1902_v25  ;;  %1479 = vmatpush2.bf16.msra.mxu1 %v1942_v42 }
  0xc8   :  { %1480 = vmatprep.subr.bf16.mxu1 %v1947_v44  ;;  %v1000_v44 = vrot.slane %v983_v13, %v999_v35 }
  0xca   :  { %1440 = vmatpush2.bf16.msra.mxu0 %v1900_v28 }
  0xcb   :  { %1441 = vmatprep.subr.bf16.mxu0 %v1908_v29  ;;  %1481 = vmatpush2.bf16.msra.mxu1 %v1945_v47 }
  0xcc   :  { %1482 = vmatprep.subr.bf16.mxu1 %v1950_v4 }
  0xce   :  { %1442 = vmatpush2.bf16.msra.mxu0 %v1906_v32 }
  0xcf   :  { %1443 = vmatprep.subr.bf16.mxu0 %v1914_v33  ;;  %1483 = vmatpush2.bf16.msra.mxu1 %v1948_v50  ;;  %v995_v33 = vsub.s32 2, %v2129_v5 }
  0xd0   :  { %1484 = vmatprep.subr.bf16.mxu1 %v1953_v51 }
  0xd1   :  { %v996_v39 = vrot.slane %v983_v13, %v995_v33 }
  0xd2   :  { %1444 = vmatpush2.bf16.msra.mxu0 %v1912_v37 }
  0xd3   :  { %1445 = vmatprep.subr.bf16.mxu0 %v1920_v38  ;;  %1485 = vmatpush2.bf16.msra.mxu1 %v1951_v53 }
  0xd4   :  { %1486 = vmatprep.subr.bf16.mxu1 %v1956_v54 }
  0xd6   :  { %1446 = vmatpush2.bf16.msra.mxu0 %v1918_v40 }
  0xd7   :  { %1447 = vmatprep.subr.bf16.mxu0 %v1926_v41  ;;  %1487 = vmatpush2.bf16.msra.mxu1 %v1954_v55 }
  0xd8   :  { %1488 = vmatprep.subr.bf16.mxu1 %v1959_v56 }
  0xda   :  { %1448 = vmatpush2.bf16.msra.mxu0 %v1924_v45 }
  0xdb   :  { %1449 = vmatprep.subr.bf16.mxu0 %v1932_v46  ;;  %1489 = vmatpush2.bf16.msra.mxu1 %v1957_v57 }
  0xdc   :  { %1490 = vmatprep.subr.bf16.mxu1 %v1962_v58 }
  0xde   :  { %1450 = vmatpush2.bf16.msra.mxu0 %v1930_v48 }
  0xdf   :  { %1451 = vmatprep.subr.bf16.mxu0 %v1938_v49  ;;  %1491 = vmatpush2.bf16.msra.mxu1 %v1960_v59  ;;  %v1089_v59 = vld [vmem:[%s2201_s6] sm:$0x3] }
  0xe0   :  { %1492 = vmatprep.subr.bf16.mxu1 %v1965_v61  ;;  %v1094_v61 = vrot.slane %v1089_v59, %v2168_v12 }
  0xe2   :  { %1452 = vmatpush2.bf16.msra.mxu0 %v1936_v52 }
  0xe3   :  { %1493 = vmatpush2.bf16.msra.mxu1 %v1963_v62  ;;  %v1098_v62 = vrot.slane %v1089_v59, %v2174_v14 }
 0x105   :  { %v278_v63 = vpop.f32.mrf.mxu0  ;;  %v319_v1 = vpop.f32.mrf.mxu1 }
 0x107   :  { %v280_v0 = vpop.f32.mrf.mxu0  ;;  %v321_v3 = vpop.f32.mrf.mxu1 }
 0x109   :  { %v282_v2 = vpop.f32.mrf.mxu0  ;;  %v323_v7 = vpop.f32.mrf.mxu1 }
 0x10b   :  { %v283_v6 = vpop.f32.mrf.mxu0  ;;  %v324_v8 = vpop.f32.mrf.mxu1 }
 0x125   :  { %v894_v9 = vpop.f32.mrf.mxu1 }
 0x127   :  { %v896_v10 = vpop.f32.mrf.mxu1 }
 0x129   :  { %v898_v11 = vpop.f32.mrf.mxu1 }
 0x12b   :  { %v899_v60 = vpop.f32.mrf.mxu1 }
 0x145   :  { %v853_v15 = vpop.f32.mrf.mxu0 }
 0x146   :  { %v854_v16 = vadd.f32 %v853_v15, %v278_v63 }
 0x147   :  { %v855_v18 = vpop.f32.mrf.mxu0 }
 0x148   :  { %v895_v19 = vadd.f32 %v894_v9, %v854_v16  ;;  %v856_v20 = vadd.f32 %v855_v18, %v280_v0  ;;  %v1509_v0 = vld [vmem:[%s2202_s7] sm:$0x3] }
 0x149   :  { %v857_v22 = vpop.f32.mrf.mxu0  ;;  %v1514_v7 = vrot.slane %v1509_v0, %v2168_v12  ;;  %v1518_v11 = vrot.slane %v1509_v0, %v2174_v14  ;;  %v1713_v12 = vld [vmem:[#allocation2] ss:$0 sm:$0xff] }
 0x14a   :  { %v1005_v23 = vadd.f32 %v988_v17, %v895_v19  ;;  %v897_v24 = vadd.f32 %v896_v10, %v856_v20 }
 0x14b   :  { %v858_v25 = vpop.f32.mrf.mxu0 }
 0x14c   :  { %vm1009_vm4 = vcmp.gt.f32.partialorder %v1005_v23, 0.0  ;;  %v1013_v26 = vmul.f32 0.01, %v1005_v23  ;;  %v1006_v27 = vadd.f32 %v992_v21, %v897_v24 }
 0x14e   :  { %vm1010_vm5 = vcmp.gt.f32.partialorder %v1006_v27, 0.0  ;;  %v1014_v28 = vmul.f32 0.01, %v1006_v27  ;;  %v1017_v29 = vsel %vm1009_vm4, %v1005_v23, %v1013_v26 }
 0x14f   :  { %v1021_v32 = vpack.c.bf16 %v1017_v29, %v1017_v29 }
 0x150   :  { %v1018_v30 = vsel %vm1010_vm5, %v1006_v27, %v1014_v28 }
 0x151   :  { %v1022_v31 = vpack.c.bf16 %v1018_v30, %v1018_v30 }
 0x153   :  { %1453 = vmatprep.mubr.bf16.mxu0 %v1022_v31 }
 0x154   :  { %1454 = vmatmul.mubr.bf16.vlgmr.msra.gmra.mxu0 %v1021_v32 }
 0x165   :  { %v976_v34 = vpop.f32.mrf.mxu0 }
 0x166   :  { %v935_v36 = vpop.f32.mrf.mxu1 }
 0x167   :  { %v978_v37 = vpop.f32.mrf.mxu0  ;;  %v936_v38 = vadd.f32 %v935_v36, %v319_v1 }
 0x168   :  { %v937_v40 = vpop.f32.mrf.mxu1 }
 0x169   :  { %v980_v41 = vpop.f32.mrf.mxu0  ;;  %v977_v42 = vadd.f32 %v976_v34, %v936_v38  ;;  %v938_v43 = vadd.f32 %v937_v40, %v321_v3 }
 0x16a   :  { %v939_v45 = vpop.f32.mrf.mxu1 }
 0x16b   :  { %v981_v46 = vpop.f32.mrf.mxu0  ;;  %v1007_v47 = vadd.f32 %v996_v39, %v977_v42  ;;  %v979_v4 = vadd.f32 %v978_v37, %v938_v43 }
 0x16c   :  { %v940_v48 = vpop.f32.mrf.mxu1 }
 0x16d   :  { %vm1011_vm6 = vcmp.gt.f32.partialorder %v1007_v47, 0.0  ;;  %v1015_v49 = vmul.f32 0.01, %v1007_v47  ;;  %v1008_v50 = vadd.f32 %v1000_v44, %v979_v4 }
 0x16f   :  { %vm1012_vm7 = vcmp.gt.f32.partialorder %v1008_v50, 0.0  ;;  %v1016_v51 = vmul.f32 0.01, %v1008_v50  ;;  %v1019_v5 = vsel %vm1011_vm6, %v1007_v47, %v1015_v49 }
 0x170   :  { %v1023_v54 = vpack.c.bf16 %v1019_v5, %v1019_v5 }
 0x171   :  { %v1020_v52 = vsel %vm1012_vm7, %v1008_v50, %v1016_v51 }
 0x172   :  { %v1024_v53 = vpack.c.bf16 %v1020_v52, %v1020_v52 }
 0x174   :  { %1494 = vmatprep.mubr.bf16.mxu1 %v1024_v53 }
 0x175   :  { %1495 = vmatmul.mubr.bf16.vlgmr.msra.gmra.mxu1 %v1023_v54 }
 0x214   :  { %v1455_v55 = vpop.f32.mrf.mxu0 }
 0x215   :  { %v1456_v63 = vadd.f32 %v1455_v55, %v1094_v61 }
 0x216   :  { %v1457_v56 = vpop.f32.mrf.mxu0 }
 0x217   :  { %v1458_v2 = vadd.f32 %v1457_v56, %v1098_v62 }
 0x218   :  { %v1459_v57 = vpop.f32.mrf.mxu0 }
 0x21a   :  { %v1460_v58 = vpop.f32.mrf.mxu0 }
 0x235   :  { %v1496_v1 = vpop.f32.mrf.mxu1 }
 0x236   :  { %v1497_v3 = vadd.f32 %v1496_v1, %v1456_v63 }
 0x237   :  { %v1498_v6 = vpop.f32.mrf.mxu1 }
 0x238   :  { %vm1503_vm8 = vcmp.gt.f32.partialorder %v1497_v3, 0.0  ;;  %v1505_v8 = vmul.f32 0.01, %v1497_v3  ;;  %v1499_v9 = vadd.f32 %v1498_v6, %v1458_v2 }
 0x239   :  { %v1500_v10 = vpop.f32.mrf.mxu1 }
 0x23a   :  { %vm1504_vm9 = vcmp.gt.f32.partialorder %v1499_v9, 0.0  ;;  %v1506_v60 = vmul.f32 0.01, %v1499_v9  ;;  %v1507_v13 = vsel %vm1503_vm8, %v1497_v3, %v1505_v8 }
 0x23b   :  { %v1501_v15 = vpop.f32.mrf.mxu1  ;;  %v1521_v16 = vmul.f32 %v1514_v7, %v1507_v13 }
 0x23c   :  { %v1508_v17 = vsel %vm1504_vm9, %v1499_v9, %v1506_v60 }
 0x23d   :  { %v1522_v18 = vmul.f32 %v1518_v11, %v1508_v17  ;;  %v1523_v19 = vsel %vm231_vm0, %v1521_v16, 0.0 }
 0x23f   :  { %v1524_v20 = vsel %vm231_vm0, %v1522_v18, 0.0 }
 0x240   :  { %v1525_v21 = vadd.f32 %v1524_v20, %v1523_v19 }
 0x242   :  { %1526 = vadd.xlane.f32.xlu0 %v1525_v21 }
 0x2cb   :  { %v1527_v22 = vpop.xlane.xlu0 %1526 }
 0x2cc   :  { %v1535_v23 = vadd.f32 %v1713_v12, %v1527_v22 }
 0x2ce   :  { %1537 = vst.msk [vmem:[%s2204_s9] sm:$0x3] %vm1536_vm10, %v1535_v23 }
 0x2cf   :  { %1542 = vsyncpa [#allocation4], 1 }
 0x2d0   :  { %1543 = vsyncpa [#allocation6], 1 }
 0x2d1   :  { %1544 = vsyncpa [#allocation9], 1 }

</bundles_post_ra>
